<compile_context>
chip_gen: v7x
topology: tpu7x:2x2x1
jax: 0.10.0
libtpu: 0.0.40
codegen_flags: <defaults>
</compile_context>

<pallas_src>
import functools

import jax
import jax.numpy as jnp
from jax.experimental import pallas as pl
from jax.experimental.pallas import tpu as pltpu


# ----------------------------------------------------------------------------
# Kernels
# ----------------------------------------------------------------------------
def _wave_kernel_flat(c2_ref, f_ref, v_ref, out_ref, *, dt, embed_dim, row_len):
    """Lane-dense path: one (b_tile, T*D) block, stencil = lane roll by D.

    Within a flattened row, token t occupies lanes [t*D, (t+1)*D); the previous
    / next token is a lane rotation by +/- D.  Boundary tokens (t=0, t=T-1) are
    fixed up with a lane-index mask to reproduce replicate padding.
    """
    f = f_ref[...]                       # (b_tile, L)
    v = v_ref[...]
    c2 = c2_ref[0]                       # clamp(wave_speed)^2 (SMEM scalar)

    shift_prev = embed_dim % row_len               # 0 only when T == 1
    shift_next = (row_len - embed_dim) % row_len
    f_prev = pltpu.roll(f, shift=shift_prev, axis=1) if shift_prev else f
    f_next = pltpu.roll(f, shift=shift_next, axis=1) if shift_next else f

    lane = jax.lax.broadcasted_iota(jnp.int32, f.shape, dimension=1)
    f_prev = jnp.where(lane < embed_dim, f, f_prev)            # token 0: replicate
    f_next = jnp.where(lane >= row_len - embed_dim, f, f_next)  # token T-1: replicate

    lap = f_next - 2.0 * f + f_prev
    # Same op order as the reference: acc = c^2*lap; new_v = v + dt*acc.
    out_ref[...] = v + dt * (c2 * lap)


def _wave_kernel_tiled(c2_ref, f_ref, v_ref, lo_ref, hi_ref, out_ref, *,
                       dt, t_tile, num_tokens):
    """Token-tiled path: (B, t_tile, d_tile) blocks with 1-row halos.

    lo_ref / hi_ref carry the token row immediately before / after this tile
    (tiny (1, B, 1, d_tile) blocks), so no block overlap or manual DMA is
    needed.  Global boundaries (t=0, t=T-1) are fixed with the global token
    index, which also protects the ragged last tile's padded rows.
    """
    f = f_ref[...]                       # (B, t_tile, d_tile)
    v = v_ref[...]
    lo = lo_ref[0]                       # (B, 1, d_tile): token before this tile
    hi = hi_ref[0]                       # (B, 1, d_tile): token after this tile
    c2 = c2_ref[0]
    ti = pl.program_id(0)

    t_local = jax.lax.broadcasted_iota(jnp.int32, f.shape, dimension=1)
    t_global = t_local + ti * t_tile

    if t_tile > 1:
        f_prev = pltpu.roll(f, shift=1, axis=1)           # f[t-1] (wraps in-tile)
        f_next = pltpu.roll(f, shift=t_tile - 1, axis=1)  # f[t+1] (wraps in-tile)
    else:
        f_prev = f
        f_next = f
    # Halo rows replace the in-tile wraparound rows.
    f_prev = jnp.where(t_local == 0, lo, f_prev)
    f_next = jnp.where(t_local == t_tile - 1, hi, f_next)
    # Global replicate boundaries (also covers ragged-tile padding).
    f_prev = jnp.where(t_global == 0, f, f_prev)
    f_next = jnp.where(t_global >= num_tokens - 1, f, f_next)

    lap = f_next - 2.0 * f + f_prev
    out_ref[...] = v + dt * (c2 * lap)


# ----------------------------------------------------------------------------
# Tile / footprint selection
# ----------------------------------------------------------------------------
def _default_tile_cap_bytes():
    """Per-block byte budget: 2 MiB is safe on v7x (64 MiB physical VMEM);
    use 4 MiB on 128-MiB-VMEM parts (v5e/v6e) for slightly better streaming."""
    cap = 2 << 20
    try:
        info = pltpu.get_tpu_info()
        if getattr(info, "vmem_capacity_bytes", 0) >= (100 << 20):
            cap = 4 << 20
    except Exception:  # pragma: no cover - info query is best-effort only
        pass
    return cap


def _vmem_limit_bytes(per_step_bytes):
    """Derived scoped-VMEM limit: double-buffered footprint + headroom,
    clamped to stay v7x-safe (<= 32 MiB) and above v5e's 16 MiB default."""
    return int(min(max(2 * per_step_bytes + (8 << 20), 16 << 20), 32 << 20))


def _choose_token_tiles(B, T, D, itemsize, cap):
    """Big-row path: prefer full D (long contiguous DMA rows), tile T in
    multiples of 8; tile D (multiples of 128) only as a last resort."""
    if T >= 8 and B * 8 * D * itemsize <= cap:
        t_tile = (cap // (B * D * itemsize)) // 8 * 8
        t_tile = int(max(min(t_tile, T), 8))
        if t_tile >= T:
            t_tile = T
        d_tile = D
    else:
        t_tile = T if T < 8 else 8
        if D <= 128:
            d_tile = D
        else:
            d_tile = (cap // (B * t_tile * itemsize)) // 128 * 128
            d_tile = int(min(max(d_tile, 128), D))
        # TODO(synk): extreme (huge-B x huge-D) corner can still exceed the
        # cap here; the derived vmem_limit makes that fail fast at compile.
    return t_tile, d_tile


# ----------------------------------------------------------------------------
# Wrapper
# ----------------------------------------------------------------------------
def wave_operator_forward(fields, velocities, wave_speed, dt=0.01, *,
                          tile_cap_bytes=None):
    """Pallas implementation of WaveOperator.forward.

    fields, velocities: (B, T, D) float32;  wave_speed: scalar parameter.
    Returns (field_evolution, new_velocities); both alias the same array.
    """
    assert fields.shape == velocities.shape and fields.ndim == 3
    B, T, D = fields.shape
    itemsize = jnp.dtype(fields.dtype).itemsize
    cap = int(tile_cap_bytes) if tile_cap_bytes is not None else _default_tile_cap_bytes()
    dt = float(dt)

    c = jnp.clip(wave_speed, 0.1, 10.0)
    c2 = (c * c).reshape((1,)).astype(jnp.float32)   # scalar prefetch (SMEM)

    row_bytes = T * D * itemsize

    # ------------------------------------------------------------------ path A
    def _run_flat(b_tile):
        L = T * D
        x = fields.reshape(B, L)          # free view: T and D are adjacent
        vel = velocities.reshape(B, L)
        grid = (pl.cdiv(B, b_tile),)
        block = pl.BlockSpec((b_tile, L), lambda bi, c2_ref: (bi, 0))
        kernel = functools.partial(_wave_kernel_flat, dt=dt, embed_dim=D, row_len=L)
        per_step = 3 * b_tile * L * itemsize
        out = pl.pallas_call(
            kernel,
            out_shape=jax.ShapeDtypeStruct((B, L), fields.dtype),
            grid_spec=pltpu.PrefetchScalarGridSpec(
                num_scalar_prefetch=1,
                grid=grid,
                in_specs=[block, block],
                out_specs=block,
            ),
            compiler_params=pltpu.CompilerParams(
                dimension_semantics=("parallel",),
                vmem_limit_bytes=_vmem_limit_bytes(per_step),
            ),
        )(c2, x, vel)
        return out.reshape(B, T, D)

    # ------------------------------------------------------------------ path B
    def _run_token_tiled(t_tile, d_tile):
        nT = pl.cdiv(T, t_tile)
        starts = jnp.arange(nT, dtype=jnp.int32) * t_tile
        lo_idx = jnp.maximum(starts - 1, 0)              # row just before each tile
        hi_idx = jnp.minimum(starts + t_tile, T - 1)     # row just after each tile
        # Halo rows laid out as (nT, B, 1, D) so their BlockSpec's last two
        # dims are (1, d_tile) -> always (8,128)-legal (1 == full dim).
        halo_lo = jnp.transpose(fields[:, lo_idx, :], (1, 0, 2))[:, :, None, :]
        halo_hi = jnp.transpose(fields[:, hi_idx, :], (1, 0, 2))[:, :, None, :]

        grid = (nT, pl.cdiv(D, d_tile))
        fld_block = pl.BlockSpec((B, t_tile, d_tile),
                                 lambda ti, di, c2_ref: (0, ti, di))
        halo_block = pl.BlockSpec((1, B, 1, d_tile),
                                  lambda ti, di, c2_ref: (ti, 0, 0, di))
        kernel = functools.partial(_wave_kernel_tiled, dt=dt, t_tile=t_tile,
                                   num_tokens=T)
        per_step = (3 * B * t_tile * d_tile + 2 * B * d_tile) * itemsize
        return pl.pallas_call(
            kernel,
            out_shape=jax.ShapeDtypeStruct((B, T, D), fields.dtype),
            grid_spec=pltpu.PrefetchScalarGridSpec(
                num_scalar_prefetch=1,
                grid=grid,
                in_specs=[fld_block, fld_block, halo_block, halo_block],
                out_specs=fld_block,
            ),
            compiler_params=pltpu.CompilerParams(
                dimension_semantics=("parallel", "parallel"),
                vmem_limit_bytes=_vmem_limit_bytes(per_step),
            ),
        )(c2, fields, velocities, halo_lo, halo_hi)

    # --------------------------------------------------------------- dispatch
    if B * row_bytes <= cap:
        # Whole problem in one lane-dense block per (small) batch group.
        out = _run_flat(B)
    elif B >= 8 and 8 * row_bytes <= cap:
        # Batch-tiled, lane-dense, fully contiguous DMAs; >= 2 grid steps.
        b_tile = (cap // row_bytes) // 8 * 8
        b_tile = int(min(max(b_tile, 8), (B // 8) * 8))
        out = _run_flat(b_tile)
    else:
        # Rows too big for a single block: tile the token axis with halos
        # (keeps the pipelined VMEM footprint bounded for any T).
        t_tile, d_tile = _choose_token_tiles(B, T, D, itemsize, cap)
        out = _run_token_tiled(t_tile, d_tile)

    # field_evolution and new_velocities are the same tensor in the module.
    return out, out


# ----------------------------------------------------------------------------
# Pure-JAX reference (mirrors the PyTorch code line-by-line)
# ----------------------------------------------------------------------------
def _reference(fields, velocities, wave_speed, dt=0.01):
    B, T, D = fields.shape
    c = jnp.clip(wave_speed, 0.1, 10.0)
    lap = jnp.zeros_like(fields)
    if T > 2:
        lap = lap.at[:, 1:-1, :].set(
            fields[:, 2:, :] - 2.0 * fields[:, 1:-1, :] + fields[:, :-2, :])
    if T > 1:
        lap = lap.at[:, 0, :].set(fields[:, 1, :] - fields[:, 0, :])
        lap = lap.at[:, -1, :].set(fields[:, -2, :] - fields[:, -1, :])
    acc = c ** 2 * lap
    new_v = velocities + dt * acc
    return new_v, new_v


if __name__ == "__main__":
    key = jax.random.PRNGKey(0)
    k1, k2, k3, k4 = jax.random.split(key, 4)

    # Deterministic parameter init (matches nn.Parameter(torch.tensor(1.0))).
    wave_speed = jnp.float32(1.0)

    # Small shapes consistent with the module: batch=2, num_tokens=8, embed_dim=32.
    B, T, D = 2, 8, 32
    fields = jax.random.normal(k1, (B, T, D), dtype=jnp.float32)
    velocities = jax.random.normal(k2, (B, T, D), dtype=jnp.float32)

    evo, new_v = wave_operator_forward(fields, velocities, wave_speed)
    jax.block_until_ready((evo, new_v))
    ref_evo, ref_v = _reference(fields, velocities, wave_speed)
    assert jnp.allclose(evo, ref_evo, atol=1e-6, rtol=1e-6)
    assert jnp.allclose(new_v, ref_v, atol=1e-6, rtol=1e-6)

    # Also exercise the token-tiled (halo) path at a small size by forcing a
    # tiny per-block budget, and check it against the reference.
    B2, T2, D2 = 2, 64, 32
    f2 = jax.random.normal(k3, (B2, T2, D2), dtype=jnp.float32)
    v2 = jax.random.normal(k4, (B2, T2, D2), dtype=jnp.float32)
    evo2, _ = wave_operator_forward(f2, v2, wave_speed, tile_cap_bytes=4096)
    jax.block_until_ready(evo2)
    ref2, _ = _reference(f2, v2, wave_speed)
    assert jnp.allclose(evo2, ref2, atol=1e-6, rtol=1e-6)

    print("KERNEL_OK")
</pallas_src>

<mosaic_0001>
module attributes {stable_mosaic.version = 11 : i64} {
  func.func @_wave_kernel_flat(%arg0: i32, %arg1: memref<1xf32, #tpu.memory_space<smem>>, %arg2: memref<2x256xf32, #tpu.memory_space<vmem>>, %arg3: memref<2x256xf32, #tpu.memory_space<vmem>>, %arg4: memref<2x256xf32, #tpu.memory_space<vmem>>) attributes {dimension_semantics = [#tpu.dimension_semantics<parallel>], iteration_bounds = array<i64: 1>, scalar_prefetch = 1 : i64, scratch_operands = 0 : i64, tpu.core_type = #tpu.core_type<tc>, window_params = [{transform_indices = @transform_0, window_bounds = array<i64: 2, 256>}, {transform_indices = @transform_1, window_bounds = array<i64: 2, 256>}, {transform_indices = @transform_2, window_bounds = array<i64: 2, 256>}]} {
    %c0 = arith.constant 0 : index
    %c0_0 = arith.constant 0 : index
    %0 = vector.load %arg2[%c0, %c0_0] : memref<2x256xf32, #tpu.memory_space<vmem>>, vector<2x256xf32>
    %c0_1 = arith.constant 0 : index
    %c0_2 = arith.constant 0 : index
    %1 = vector.load %arg3[%c0_1, %c0_2] : memref<2x256xf32, #tpu.memory_space<vmem>>, vector<2x256xf32>
    %c0_3 = arith.constant 0 : index
    %2 = memref.load %arg1[%c0_3] : memref<1xf32, #tpu.memory_space<smem>>
    %c32_i32 = arith.constant 32 : i32
    %3 = tpu.dynamic_rotate %0 by %c32_i32 dim 1 : vector<2x256xf32>, i32 -> vector<2x256xf32>
    %c224_i32 = arith.constant 224 : i32
    %4 = tpu.dynamic_rotate %0 by %c224_i32 dim 1 : vector<2x256xf32>, i32 -> vector<2x256xf32>
    %5 = tpu.iota {dimensions = array<i32: 1>} : vector<2x256xi32>
    %c32_i32_4 = arith.constant 32 : i32
    %6 = vector.broadcast %c32_i32_4 : i32 to vector<2x256xi32>
    %7 = arith.cmpi slt, %5, %6 : vector<2x256xi32>
    %8 = arith.select %7, %0, %3 : vector<2x256xi1>, vector<2x256xf32>
    %c224_i32_5 = arith.constant 224 : i32
    %9 = vector.broadcast %c224_i32_5 : i32 to vector<2x256xi32>
    %10 = arith.cmpi sge, %5, %9 : vector<2x256xi32>
    %11 = arith.select %10, %0, %4 : vector<2x256xi1>, vector<2x256xf32>
    %cst = arith.constant 2.000000e+00 : f32
    %12 = vector.broadcast %cst : f32 to vector<2x256xf32>
    %13 = arith.mulf %12, %0 : vector<2x256xf32>
    %14 = arith.subf %11, %13 : vector<2x256xf32>
    %15 = arith.addf %14, %8 : vector<2x256xf32>
    %16 = vector.broadcast %2 : f32 to vector<2x256xf32>
    %17 = arith.mulf %16, %15 : vector<2x256xf32>
    %cst_6 = arith.constant 0.00999999977 : f32
    %18 = vector.broadcast %cst_6 : f32 to vector<2x256xf32>
    %19 = arith.mulf %18, %17 : vector<2x256xf32>
    %20 = arith.addf %1, %19 : vector<2x256xf32>
    %c0_7 = arith.constant 0 : index
    %c0_8 = arith.constant 0 : index
    %21 = vector.load %arg4[%c0_7, %c0_8] : memref<2x256xf32, #tpu.memory_space<vmem>>, vector<2x256xf32>
    tpu.vector_store %arg4[%c0_7, %c0_8], %20 {strides = array<i32>} : memref<2x256xf32, #tpu.memory_space<vmem>>, vector<2x256xf32>,
    return
  }
  func.func @transform_0(%arg0: i32, %arg1: memref<1xf32, #tpu.memory_space<smem>>) -> (i32, i32) {
    %c0_i32 = arith.constant 0 : i32
    %c0_i32_0 = arith.constant 0 : i32
    return %arg0, %c0_i32 : i32, i32
  }
  func.func @transform_1(%arg0: i32, %arg1: memref<1xf32, #tpu.memory_space<smem>>) -> (i32, i32) {
    %c0_i32 = arith.constant 0 : i32
    %c0_i32_0 = arith.constant 0 : i32
    return %arg0, %c0_i32 : i32, i32
  }
  func.func @transform_2(%arg0: i32, %arg1: memref<1xf32, #tpu.memory_space<smem>>) -> (i32, i32) {
    %c0_i32 = arith.constant 0 : i32
    %c0_i32_0 = arith.constant 0 : i32
    return %arg0, %c0_i32 : i32, i32
  }
}

</mosaic_0001>

<bundles_post_ra>
// kernel: tpu_custom_call.1
= control target key start
LH: loop header
LB: loop body
LE: loop exit
PB: predicated region body
PF: predicated region fallthrough
CT: control target
= control target key end

     0   :  { %9 = vsyncpa [#allocation5], 0  ;;  %s221_s0 = inlined_call_operand.<no memory space> [shape: f32[1], index: 0, kind: input, shape index: {}]   ;;  %s222_s1 = inlined_call_operand.hbm [shape: f32[2,256], index: 1, kind: input, shape index: {}]   ;;  %s223_s2 = inlined_call_operand.vmem [shape: f32[2,256], index: 2, kind: input, shape index: {}]   ;;  %s224_s3 = inlined_call_operand.hbm [shape: f32[2,256], index: 3, kind: output, shape index: {}]  }
   0x1   :  { %10 = vsyncpa [#allocation6], 0  ;;  %s166_s12 = smov [#allocation4]   ;;  %s118_s16 = scalar_lea.hbm %s222_s1, 64 }
   0x2   :  { %s17_s13 = sshll.u32 %s166_s12, 4  ;;  %p119_p0 = scmp.ne.s32.totalorder %s222_s1, %s118_s16  ;;  %s18_s13 = int_to_ptr.vmem [resolvable:$true] %s17_s13 }
   0x3   :  { %p122_p1 = scmp.lt.u32.totalorder %s118_s16, %s222_s1 }
   0x5   :  { %p124_p2 = pnand %p122_p1, %p119_p0 }
   0x7   :  { %127 = shalt.err (!%p124_p2)
}
   0x8   :  { %s128_s21 = scalar_lea.vmem %s18_s13, 64  ;;  %p133_p4 = scmp.lt.s32.totalorder %s18_s13, %s18_s13 }
   0x9   :  { %p129_p3 = scmp.ne.s32.totalorder %s18_s13, %s128_s21  ;;  %p134_p5 = scmp.lt.s32.totalorder %s128_s21, %s128_s21 }
   0xb   :  { %p135_p6 = por %p134_p5, %p133_p4 }
   0xd   :  { %p136_p7 = pnand %p135_p6, %p129_p3 }
   0xf   :  { %139 = shalt.err (!%p136_p7)
}
  0x10   :  { %20 = dma.hbm_to_vmem [thread:$0]  %s222_s1, 64, %s18_s13, [#allocation5]  }
  0x11   :  { %162 = dma.done.wait [#allocation5], 64  }
  0x12   :  { %163 = vsyncadd [#allocation5], 4294967232  ;;  %v33_v0 = vlaneseq  ;;  %v167_v1 = vmov 1983009808   ;;  %v26_v6 = vld [vmem:[#allocation4] sm:$0xf]  ;;  %v80_v24 = vstv %s221_s0 }
  0x13   :  { %v31_v2 = vunpack.c.l.s4 %v167_v1  ;;  %s168_s24 = smov 32   ;;  %s169_s25 = smov 96   ;;  %v64_v10 = vmul.f32 2.0, %v26_v6  ;;  %v27_v34 = vld [vmem:[%s223_s2] sm:$0xf] }
  0x14   :  { %v34_v3 = vshrl.u32 %v33_v0, 7  ;;  %v45_v9 = vand.u32 127, %v33_v0  ;;  %s170_s29 = smov [#allocation7]  }
  0x15   :  { %v32_v4 = vunpack.c.0.s8 %v31_v2  ;;  %s104_s30 = sshll.u32 %s170_s29, 4  ;;  %s105_s30 = int_to_ptr.vmem [resolvable:$true] %s104_s30 }
  0x16   :  { %v56_v11 = vadd.s32 128, %v45_v9  ;;  %vm46_vm0 = vcmp.lt.s32.totalorder %v45_v9, 32  ;;  %vm53_vm1 = vcmp.lt.s32.totalorder %v45_v9, 96  ;;  %s140_s0 = scalar_lea.vmem %s105_s30, 64  ;;  %p145_p9 = scmp.lt.s32.totalorder %s105_s30, %s105_s30 }
  0x17   :  { %v35_v5 = vsub.s32 %v32_v4, %v34_v3  ;;  %p141_p8 = scmp.ne.s32.totalorder %s105_s30, %s140_s0  ;;  %p146_p10 = scmp.lt.s32.totalorder %s140_s0, %s140_s0 }
  0x18   :  { %vm61_vm2 = vcmp.ge.s32.totalorder %v56_v11, 224 }
  0x19   :  { %v36_v7 = vrot.slane %v26_v6, %v35_v5  ;;  %v72_v12 = vrot.slane %v64_v10, %v35_v5  ;;  %p147_p11 = por %p146_p10, %p145_p9 }
  0x1b   :  { %40 = vrot.lane.b32.xlu1 %v36_v7, %s168_s24  ;;  %49 = vrot.lane.b32.xlu0 %v36_v7, %s169_s25  ;;  %v37_v8 = vcombine.high %v36_v7, %v36_v7  ;;  %v73_v15 = vcombine.high %v72_v12, %v72_v12  ;;  %p148_p12 = pnand %p147_p11, %p141_p8 }
  0x1f   :  { %42 = vrot.lane.b32.xlu1 %v37_v8, %s168_s24  ;;  %51 = vrot.lane.b32.xlu0 %v37_v8, %s169_s25 }
  0x8d   :  { %v41_v13 = vpop.permute.xlu1 %40  ;;  %v50_v14 = vpop.permute.xlu0 %49 }
  0x91   :  { %v43_v16 = vpop.permute.xlu1 %42  ;;  %v52_v17 = vpop.permute.xlu0 %51 }
  0x92   :  { %v48_v18 = vsel %vm46_vm0, %v43_v16, %v41_v13  ;;  %v54_v19 = vsel %vm53_vm1, %v50_v14, %v52_v17  ;;  %v55_v20 = vsel %vm53_vm1, %v52_v17, %v50_v14  ;;  %v47_v26 = vsel %vm46_vm0, %v41_v13, %v43_v16 }
  0x93   :  { %v58_v21 = vsel %vm46_vm0, %v36_v7, %v48_v18  ;;  %v63_v22 = vsel %vm61_vm2, %v37_v8, %v55_v20  ;;  %v76_v23 = vsub.f32 %v54_v19, %v72_v12 }
  0x94   :  { %v77_v25 = vsub.f32 %v63_v22, %v73_v15 }
  0x95   :  { %v78_v27 = vadd.f32 %v76_v23, %v58_v21 }
  0x96   :  { %v79_v28 = vadd.f32 %v77_v25, %v47_v26 }
  0x97   :  { %v81_v29 = vmul.f32 %v80_v24, %v78_v27 }
  0x98   :  { %v82_v30 = vmul.f32 %v80_v24, %v79_v28 }
  0x99   :  { %v83_v31 = vmul.f32 0.01, %v81_v29 }
  0x9a   :  { %v84_v32 = vmul.f32 0.01, %v82_v30 }
  0x9c   :  { %v87_v33 = vcombine.low %v83_v31, %v84_v32 }
  0x9e   :  { %v94_v35 = vrot.slane %v87_v33, %v35_v5 }
  0xa0   :  { %v96_v36 = vadd.f32 %v94_v35, %v27_v34 }
  0xa2   :  { %97 = vst [vmem:[#allocation7] sm:$0xf] %v96_v36 }
  0xa3   :  { %151 = shalt.err (!%p148_p12)
}
  0xa4   :  { %s152_s6 = scalar_lea.hbm %s224_s3, 64 }
  0xa5   :  { %p153_p13 = scmp.ne.s32.totalorder %s224_s3, %s152_s6  ;;  %p156_p0 = scmp.lt.u32.totalorder %s152_s6, %s224_s3 }
  0xa7   :  { %p158_p1 = pnand %p156_p0, %p153_p13 }
  0xa9   :  { %161 = shalt.err (!%p158_p1)
}
  0xaa   :  { %107 = dma.vmem_to_hbm [thread:$0]  %s105_s30, 64, %s224_s3, [#allocation6]  }
  0xab   :  { %164 = dma.done.wait [#allocation6], 64  }
  0xac   :  { %165 = vsyncadd [#allocation6], 4294967232 }
  0xad   :  { %111 = vsyncpa [#allocation5], 1 }
  0xae   :  { %112 = vsyncpa [#allocation6], 1 }

</bundles_post_ra>
